<compile_context>
chip_gen: v7x
topology: tpu7x:2x2x1
jax: 0.10.0
libtpu: 0.0.40
codegen_flags: <defaults>
</compile_context>

<pallas_src>
import functools

import jax
import jax.numpy as jnp
import numpy as np
from jax.experimental import pallas as pl
from jax.experimental.pallas import tpu as pltpu

ALPHAS = 0.25
GAMMA = 2.0
SIGMA = 3.0
NUM_CORES = 2          # v7x has 2 TensorCores; harmless (serial) on v5e/v6e.


def _round_up(x, m):
  return ((x + m - 1) // m) * m


def _focal_loss_kernel(ct_ref, cp_ref, rt_ref, rp_ref, loss_ref, pos_ref, *,
                       alphas, gamma, sigma_sq):
  """Processes one channels-first (features, tile_n) slab of anchors."""
  i = pl.program_id(1)

  @pl.when(i == 0)
  def _():
    loss_ref[...] = jnp.zeros_like(loss_ref)
    pos_ref[...] = jnp.zeros_like(pos_ref)

  ct = ct_ref[...].astype(jnp.float32)   # (C+1, tile_n)
  cp = cp_ref[...].astype(jnp.float32)   # (C,   tile_n)
  rt = rt_ref[...].astype(jnp.float32)   # (R+1, tile_n)
  rp = rp_ref[...].astype(jnp.float32)   # (R,   tile_n)

  # ---------------- focal classification loss ----------------
  labels = ct[:-1, :]                     # (C, tile_n)
  cls_state = ct[-1:, :]                  # (1, tile_n)
  cls_mask = (cls_state != -1.0).astype(jnp.float32)   # drop "ignore" anchors

  is_pos = labels == 1.0
  alphas_factor = jnp.where(is_pos, alphas, 1.0 - alphas)
  fw_base = jnp.where(is_pos, 1.0 - cp, cp)
  if gamma == 2.0:
    fw = alphas_factor * fw_base * fw_base
  else:
    fw = alphas_factor * jnp.power(fw_base, gamma)
  # Full binary_cross_entropy with PyTorch-style log clamp (log >= -100);
  # exact match to the module even for non-binary label values.
  log_p = jnp.maximum(jnp.log(cp), -100.0)
  log_1mp = jnp.maximum(jnp.log(1.0 - cp), -100.0)
  bce = -(labels * log_p + (1.0 - labels) * log_1mp)
  cls_loss = fw * bce                                               # (C, tile_n)
  cls_row = jnp.sum(cls_loss, axis=0, keepdims=True) * cls_mask     # (1, tile_n)

  # ---------------- smooth L1 regression loss ----------------
  targets = rt[:-1, :]                    # (R, tile_n)
  reg_state = rt[-1:, :]                  # (1, tile_n)
  pos_mask = (reg_state == 1.0).astype(jnp.float32)

  diff = jnp.abs(rp - targets)
  sl1 = jnp.where(diff < 1.0 / sigma_sq,
                  (0.5 * sigma_sq) * diff * diff,
                  diff - 0.5 / sigma_sq)
  reg_row = jnp.sum(sl1, axis=0, keepdims=True) * pos_mask          # (1, tile_n)

  # Per-lane partial accumulation into the resident output blocks (pure VALU
  # adds per step; the cross-lane reduction happens once, in the wrapper).
  loss_ref[...] += (cls_row + reg_row)[None, :, :]
  pos_ref[...] += pos_mask[None, :, :]


def _channels_first(x, n, n_pad):
  """(B, A, F) -> (F, n_pad) channels-first with zero padding on the lane axis.

  Zero-padded columns contribute exactly 0: labels=0, pred=0 gives fw=0 and
  bce=0; reg state=0 is not positive.
  """
  f = x.shape[-1]
  xt = x.reshape(n, f).T                  # transpose + pad fuse into one copy
  return jnp.pad(xt, ((0, 0), (0, n_pad - n)))


def focal_loss(cls_true, cls_pred, reg_true, reg_pred,
               alphas=ALPHAS, gamma=GAMMA, sigma=SIGMA,
               tile_n=32768, num_cores=NUM_CORES):
  """Returns (loss, positive), each shaped (1,) float32 (matches the PyTorch module)."""
  sigma_sq = float(sigma) * float(sigma)
  B, A, cp1 = cls_true.shape
  C = cp1 - 1
  R = reg_pred.shape[-1]
  N = B * A

  # Lane tile: multiple of 128, no bigger than one core's share, and capped so
  # double-buffered inputs + resident outputs stay well under the smallest
  # default scoped-VMEM limit (16 MiB on v5e).
  tile_n = max(128, (int(tile_n) // 128) * 128)
  per_core = -(-N // num_cores)
  tile_n = min(tile_n, _round_up(per_core, 128))
  bytes_per_col = 4 * (2 * C + 2 * R + 2) * 2 + 4 * 2   # 2x-buffered ins + outs
  max_tile = max(128, ((12 * 1024 * 1024) // bytes_per_col) // 128 * 128)
  tile_n = min(tile_n, max_tile)

  tiles_per_core = -(-per_core // tile_n)
  n_pad = num_cores * tiles_per_core * tile_n

  ct = _channels_first(cls_true, N, n_pad)    # (C+1, n_pad)
  cpp = _channels_first(cls_pred, N, n_pad)   # (C,   n_pad)
  rt = _channels_first(reg_true, N, n_pad)    # (R+1, n_pad)
  rp = _channels_first(reg_pred, N, n_pad)    # (R,   n_pad)

  kernel = functools.partial(_focal_loss_kernel, alphas=float(alphas),
                             gamma=float(gamma), sigma_sq=sigma_sq)

  def col_map(c, i):
    return (0, c * tiles_per_core + i)

  def out_map(c, i):
    return (c, 0, 0)

  loss_part, pos_part = pl.pallas_call(
      kernel,
      out_shape=(jax.ShapeDtypeStruct((num_cores, 1, tile_n), jnp.float32),
                 jax.ShapeDtypeStruct((num_cores, 1, tile_n), jnp.float32)),
      grid=(num_cores, tiles_per_core),
      in_specs=[
          pl.BlockSpec((C + 1, tile_n), col_map),
          pl.BlockSpec((C, tile_n), col_map),
          pl.BlockSpec((R + 1, tile_n), col_map),
          pl.BlockSpec((R, tile_n), col_map),
      ],
      out_specs=(
          pl.BlockSpec((1, 1, tile_n), out_map),
          pl.BlockSpec((1, 1, tile_n), out_map),
      ),
      compiler_params=pltpu.CompilerParams(
          dimension_semantics=("parallel", "arbitrary")),
  )(ct, cpp, rt, rp)

  # Tiny one-shot reduction over the per-core / per-lane partial sums.
  loss = jnp.sum(loss_part).reshape(1)
  positive = jnp.sum(pos_part).reshape(1)
  return loss, positive


def _reference(cls_true, cls_pred, reg_true, reg_pred,
               alphas=ALPHAS, gamma=GAMMA, sigma=SIGMA):
  """Pure-JAX mirror of the PyTorch forward (for validation)."""
  sigma_sq = sigma * sigma
  labels = cls_true[..., :-1]
  cls_states = cls_true[..., -1]
  cls_mask = (cls_states != -1)[..., None].astype(jnp.float32)
  af = jnp.where(labels == 1, alphas, 1.0 - alphas)
  fw = jnp.where(labels == 1, 1.0 - cls_pred, cls_pred)
  fw = af * fw ** gamma
  bce = -(labels * jnp.maximum(jnp.log(cls_pred), -100.0)
          + (1.0 - labels) * jnp.maximum(jnp.log(1.0 - cls_pred), -100.0))
  cls_loss = jnp.sum(fw * bce * cls_mask)

  targets = reg_true[..., :-1]
  reg_states = reg_true[..., -1]
  pos = (reg_states == 1)
  diff = jnp.abs(reg_pred - targets)
  sl1 = jnp.where(diff < 1.0 / sigma_sq,
                  0.5 * sigma_sq * diff * diff,
                  diff - 0.5 / sigma_sq)
  reg_loss = jnp.sum(sl1 * pos[..., None].astype(jnp.float32))
  return cls_loss + reg_loss, jnp.sum(pos).astype(jnp.float32)


if __name__ == "__main__":
  # Module has no learnable parameters; alphas/gamma/sigma are fixed constants.
  B, A, C = 2, 100, 4   # N = 200 anchors -> exercises padding + the 2-way core split
  key = jax.random.PRNGKey(0)
  k1, k2, k3, k4, k5 = jax.random.split(key, 5)

  states = jax.random.randint(k1, (B, A), -1, 2).astype(jnp.float32)   # {-1,0,1}
  labels = jax.random.bernoulli(k2, 0.3, (B, A, C)).astype(jnp.float32)
  cls_true = jnp.concatenate([labels, states[..., None]], axis=-1)      # (B,A,C+1)
  cls_pred = jax.nn.sigmoid(jax.random.normal(k3, (B, A, C)))           # probs in (0,1)
  targets = jax.random.normal(k4, (B, A, 4))
  reg_true = jnp.concatenate([targets, states[..., None]], axis=-1)     # (B,A,5)
  reg_pred = jax.random.normal(k5, (B, A, 4))

  loss, positive = focal_loss(cls_true, cls_pred, reg_true, reg_pred)
  jax.block_until_ready((loss, positive))

  ref_loss, ref_pos = _reference(cls_true, cls_pred, reg_true, reg_pred)
  np.testing.assert_allclose(np.asarray(loss)[0], np.asarray(ref_loss), rtol=1e-4)
  np.testing.assert_allclose(np.asarray(positive)[0], np.asarray(ref_pos), rtol=0, atol=0)

  print("KERNEL_OK")
</pallas_src>

<mosaic_0001>
module attributes {stable_mosaic.version = 11 : i64} {
  func.func @_focal_loss_kernel(%arg0: i32, %arg1: i32, %arg2: memref<5x128xf32, #tpu.memory_space<vmem>>, %arg3: memref<4x128xf32, #tpu.memory_space<vmem>>, %arg4: memref<5x128xf32, #tpu.memory_space<vmem>>, %arg5: memref<4x128xf32, #tpu.memory_space<vmem>>, %arg6: memref<1x1x128xf32, #tpu.memory_space<vmem>>, %arg7: memref<1x1x128xf32, #tpu.memory_space<vmem>>) attributes {dimension_semantics = [#tpu.dimension_semantics<parallel>, #tpu.dimension_semantics<arbitrary>], iteration_bounds = array<i64: 2, 1>, scalar_prefetch = 0 : i64, scratch_operands = 0 : i64, tpu.core_type = #tpu.core_type<tc>, window_params = [{transform_indices = @transform_0, window_bounds = array<i64: 5, 128>}, {transform_indices = @transform_1, window_bounds = array<i64: 4, 128>}, {transform_indices = @transform_2, window_bounds = array<i64: 5, 128>}, {transform_indices = @transform_3, window_bounds = array<i64: 4, 128>}, {transform_indices = @transform_4, window_bounds = array<i64: 1, 1, 128>}, {transform_indices = @transform_5, window_bounds = array<i64: 1, 1, 128>}]} {
    %c0_i32 = arith.constant 0 : i32
    %0 = arith.cmpi eq, %arg1, %c0_i32 : i32
    %1 = arith.extui %0 : i1 to i32
    %c0_i32_0 = arith.constant 0 : i32
    %2 = arith.cmpi ne, %1, %c0_i32_0 : i32
    scf.if %2 {
      %cst_35 = arith.constant 0.000000e+00 : f32
      %70 = vector.broadcast %cst_35 : f32 to vector<1x1x128xf32>
      %c0_36 = arith.constant 0 : index
      %c0_37 = arith.constant 0 : index
      %c0_38 = arith.constant 0 : index
      %71 = vector.load %arg6[%c0_36, %c0_37, %c0_38] : memref<1x1x128xf32, #tpu.memory_space<vmem>>, vector<1x1x128xf32>
      tpu.vector_store %arg6[%c0_36, %c0_37, %c0_38], %70 {strides = array<i32>} : memref<1x1x128xf32, #tpu.memory_space<vmem>>, vector<1x1x128xf32>,
      %cst_39 = arith.constant 0.000000e+00 : f32
      %72 = vector.broadcast %cst_39 : f32 to vector<1x1x128xf32>
      %c0_40 = arith.constant 0 : index
      %c0_41 = arith.constant 0 : index
      %c0_42 = arith.constant 0 : index
      %73 = vector.load %arg7[%c0_40, %c0_41, %c0_42] : memref<1x1x128xf32, #tpu.memory_space<vmem>>, vector<1x1x128xf32>
      tpu.vector_store %arg7[%c0_40, %c0_41, %c0_42], %72 {strides = array<i32>} : memref<1x1x128xf32, #tpu.memory_space<vmem>>, vector<1x1x128xf32>,
    } else {
    }
    %c0 = arith.constant 0 : index
    %c0_1 = arith.constant 0 : index
    %3 = vector.load %arg2[%c0, %c0_1] : memref<5x128xf32, #tpu.memory_space<vmem>>, vector<5x128xf32>
    %c0_2 = arith.constant 0 : index
    %c0_3 = arith.constant 0 : index
    %4 = vector.load %arg3[%c0_2, %c0_3] : memref<4x128xf32, #tpu.memory_space<vmem>>, vector<4x128xf32>
    %c0_4 = arith.constant 0 : index
    %c0_5 = arith.constant 0 : index
    %5 = vector.load %arg4[%c0_4, %c0_5] : memref<5x128xf32, #tpu.memory_space<vmem>>, vector<5x128xf32>
    %c0_6 = arith.constant 0 : index
    %c0_7 = arith.constant 0 : index
    %6 = vector.load %arg5[%c0_6, %c0_7] : memref<4x128xf32, #tpu.memory_space<vmem>>, vector<4x128xf32>
    %7 = vector.extract_strided_slice %3 {offsets = [0, 0], sizes = [4, 128], strides = [1, 1]} : vector<5x128xf32> to vector<4x128xf32>
    %8 = vector.extract_strided_slice %3 {offsets = [4, 0], sizes = [1, 128], strides = [1, 1]} : vector<5x128xf32> to vector<1x128xf32>
    %cst = arith.constant -1.000000e+00 : f32
    %9 = vector.broadcast %cst : f32 to vector<1x128xf32>
    %10 = arith.cmpf one, %8, %9 : vector<1x128xf32>
    %11 = arith.extui %10 : vector<1x128xi1> to vector<1x128xi32>
    %12 = arith.sitofp %11 : vector<1x128xi32> to vector<1x128xf32>
    %cst_8 = arith.constant 1.000000e+00 : f32
    %13 = vector.broadcast %cst_8 : f32 to vector<4x128xf32>
    %14 = arith.cmpf oeq, %7, %13 : vector<4x128xf32>
    %cst_9 = arith.constant 2.500000e-01 : f32
    %cst_10 = arith.constant 7.500000e-01 : f32
    %15 = vector.broadcast %cst_9 : f32 to vector<4x128xf32>
    %16 = vector.broadcast %cst_10 : f32 to vector<4x128xf32>
    %17 = arith.select %14, %15, %16 : vector<4x128xi1>, vector<4x128xf32>
    %cst_11 = arith.constant 1.000000e+00 : f32
    %18 = vector.broadcast %cst_11 : f32 to vector<4x128xf32>
    %19 = arith.subf %18, %4 : vector<4x128xf32>
    %20 = arith.select %14, %19, %4 : vector<4x128xi1>, vector<4x128xf32>
    %21 = arith.mulf %17, %20 : vector<4x128xf32>
    %22 = arith.mulf %21, %20 : vector<4x128xf32>
    %23 = math.log %4 : vector<4x128xf32>
    %cst_12 = arith.constant -1.000000e+02 : f32
    %24 = vector.broadcast %cst_12 : f32 to vector<4x128xf32>
    %25 = arith.maximumf %23, %24 : vector<4x128xf32>
    %cst_13 = arith.constant 1.000000e+00 : f32
    %26 = vector.broadcast %cst_13 : f32 to vector<4x128xf32>
    %27 = arith.subf %26, %4 : vector<4x128xf32>
    %28 = math.log %27 : vector<4x128xf32>
    %cst_14 = arith.constant -1.000000e+02 : f32
    %29 = vector.broadcast %cst_14 : f32 to vector<4x128xf32>
    %30 = arith.maximumf %28, %29 : vector<4x128xf32>
    %31 = arith.mulf %7, %25 : vector<4x128xf32>
    %cst_15 = arith.constant 1.000000e+00 : f32
    %32 = vector.broadcast %cst_15 : f32 to vector<4x128xf32>
    %33 = arith.subf %32, %7 : vector<4x128xf32>
    %34 = arith.mulf %33, %30 : vector<4x128xf32>
    %35 = arith.addf %31, %34 : vector<4x128xf32>
    %cst_16 = arith.constant 0.000000e+00 : f32
    %36 = vector.broadcast %cst_16 : f32 to vector<4x128xf32>
    %37 = arith.subf %36, %35 : vector<4x128xf32>
    %38 = arith.mulf %22, %37 : vector<4x128xf32>
    %cst_17 = arith.constant dense<0.000000e+00> : vector<128xf32>
    %39 = vector.multi_reduction <add>, %38, %cst_17 [0] : vector<4x128xf32> to vector<128xf32>
    %40 = vector.shape_cast %39 : vector<128xf32> to vector<1x128xf32>
    %41 = arith.mulf %40, %12 : vector<1x128xf32>
    %42 = vector.extract_strided_slice %5 {offsets = [0, 0], sizes = [4, 128], strides = [1, 1]} : vector<5x128xf32> to vector<4x128xf32>
    %43 = vector.extract_strided_slice %5 {offsets = [4, 0], sizes = [1, 128], strides = [1, 1]} : vector<5x128xf32> to vector<1x128xf32>
    %cst_18 = arith.constant 1.000000e+00 : f32
    %44 = vector.broadcast %cst_18 : f32 to vector<1x128xf32>
    %45 = arith.cmpf oeq, %43, %44 : vector<1x128xf32>
    %46 = arith.extui %45 : vector<1x128xi1> to vector<1x128xi32>
    %47 = arith.sitofp %46 : vector<1x128xi32> to vector<1x128xf32>
    %48 = arith.subf %6, %42 : vector<4x128xf32>
    %49 = math.absf %48 : vector<4x128xf32>
    %cst_19 = arith.constant 0.111111112 : f32
    %50 = vector.broadcast %cst_19 : f32 to vector<4x128xf32>
    %51 = arith.cmpf olt, %49, %50 : vector<4x128xf32>
    %cst_20 = arith.constant 4.500000e+00 : f32
    %52 = vector.broadcast %cst_20 : f32 to vector<4x128xf32>
    %53 = arith.mulf %52, %49 : vector<4x128xf32>
    %54 = arith.mulf %53, %49 : vector<4x128xf32>
    %cst_21 = arith.constant 0.055555556 : f32
    %55 = vector.broadcast %cst_21 : f32 to vector<4x128xf32>
    %56 = arith.subf %49, %55 : vector<4x128xf32>
    %57 = arith.select %51, %54, %56 : vector<4x128xi1>, vector<4x128xf32>
    %cst_22 = arith.constant dense<0.000000e+00> : vector<128xf32>
    %58 = vector.multi_reduction <add>, %57, %cst_22 [0] : vector<4x128xf32> to vector<128xf32>
    %59 = vector.shape_cast %58 : vector<128xf32> to vector<1x128xf32>
    %60 = arith.mulf %59, %47 : vector<1x128xf32>
    %c0_23 = arith.constant 0 : index
    %c0_24 = arith.constant 0 : index
    %c0_25 = arith.constant 0 : index
    %61 = vector.load %arg6[%c0_23, %c0_24, %c0_25] : memref<1x1x128xf32, #tpu.memory_space<vmem>>, vector<1x1x128xf32>
    %62 = arith.addf %41, %60 : vector<1x128xf32>
    %63 = vector.shape_cast %62 : vector<1x128xf32> to vector<1x1x128xf32>
    %64 = arith.addf %61, %63 : vector<1x1x128xf32>
    %c0_26 = arith.constant 0 : index
    %c0_27 = arith.constant 0 : index
    %c0_28 = arith.constant 0 : index
    %65 = vector.load %arg6[%c0_26, %c0_27, %c0_28] : memref<1x1x128xf32, #tpu.memory_space<vmem>>, vector<1x1x128xf32>
    tpu.vector_store %arg6[%c0_26, %c0_27, %c0_28], %64 {strides = array<i32>} : memref<1x1x128xf32, #tpu.memory_space<vmem>>, vector<1x1x128xf32>,
    %c0_29 = arith.constant 0 : index
    %c0_30 = arith.constant 0 : index
    %c0_31 = arith.constant 0 : index
    %66 = vector.load %arg7[%c0_29, %c0_30, %c0_31] : memref<1x1x128xf32, #tpu.memory_space<vmem>>, vector<1x1x128xf32>
    %67 = vector.shape_cast %47 : vector<1x128xf32> to vector<1x1x128xf32>
    %68 = arith.addf %66, %67 : vector<1x1x128xf32>
    %c0_32 = arith.constant 0 : index
    %c0_33 = arith.constant 0 : index
    %c0_34 = arith.constant 0 : index
    %69 = vector.load %arg7[%c0_32, %c0_33, %c0_34] : memref<1x1x128xf32, #tpu.memory_space<vmem>>, vector<1x1x128xf32>
    tpu.vector_store %arg7[%c0_32, %c0_33, %c0_34], %68 {strides = array<i32>} : memref<1x1x128xf32, #tpu.memory_space<vmem>>, vector<1x1x128xf32>,
    return
  }
  func.func @transform_0(%arg0: i32, %arg1: i32) -> (i32, i32) {
    %c1_i32 = arith.constant 1 : i32
    %0 = arith.muli %arg0, %c1_i32 : i32
    %1 = arith.addi %0, %arg1 : i32
    %c0_i32 = arith.constant 0 : i32
    %c0_i32_0 = arith.constant 0 : i32
    return %c0_i32, %1 : i32, i32
  }
  func.func @transform_1(%arg0: i32, %arg1: i32) -> (i32, i32) {
    %c1_i32 = arith.constant 1 : i32
    %0 = arith.muli %arg0, %c1_i32 : i32
    %1 = arith.addi %0, %arg1 : i32
    %c0_i32 = arith.constant 0 : i32
    %c0_i32_0 = arith.constant 0 : i32
    return %c0_i32, %1 : i32, i32
  }
  func.func @transform_2(%arg0: i32, %arg1: i32) -> (i32, i32) {
    %c1_i32 = arith.constant 1 : i32
    %0 = arith.muli %arg0, %c1_i32 : i32
    %1 = arith.addi %0, %arg1 : i32
    %c0_i32 = arith.constant 0 : i32
    %c0_i32_0 = arith.constant 0 : i32
    return %c0_i32, %1 : i32, i32
  }
  func.func @transform_3(%arg0: i32, %arg1: i32) -> (i32, i32) {
    %c1_i32 = arith.constant 1 : i32
    %0 = arith.muli %arg0, %c1_i32 : i32
    %1 = arith.addi %0, %arg1 : i32
    %c0_i32 = arith.constant 0 : i32
    %c0_i32_0 = arith.constant 0 : i32
    return %c0_i32, %1 : i32, i32
  }
  func.func @transform_4(%arg0: i32, %arg1: i32) -> (i32, i32, i32) {
    %c0_i32 = arith.constant 0 : i32
    %c0_i32_0 = arith.constant 0 : i32
    %c0_i32_1 = arith.constant 0 : i32
    return %arg0, %c0_i32, %c0_i32_0 : i32, i32, i32
  }
  func.func @transform_5(%arg0: i32, %arg1: i32) -> (i32, i32, i32) {
    %c0_i32 = arith.constant 0 : i32
    %c0_i32_0 = arith.constant 0 : i32
    %c0_i32_1 = arith.constant 0 : i32
    return %arg0, %c0_i32, %c0_i32_0 : i32, i32, i32
  }
}

</mosaic_0001>

<bundles_post_ra>
// kernel: tpu_custom_call.1
= control target key start
LH: loop header
LB: loop body
LE: loop exit
PB: predicated region body
PF: predicated region fallthrough
CT: control target
= control target key end

     0   :  { %s1344_s0 = inlined_call_operand.hbm [shape: f32[5,256], index: 0, kind: input, shape index: {}]   ;;  %s1345_s1 = inlined_call_operand.hbm [shape: f32[4,256], index: 1, kind: input, shape index: {}]   ;;  %s1346_s2 = inlined_call_operand.hbm [shape: f32[5,256], index: 2, kind: input, shape index: {}]   ;;  %s1347_s3 = inlined_call_operand.vmem [shape: f32[4,256], index: 3, kind: input, shape index: {}]   ;;  %s1348_s4 = inlined_call_operand.hbm [shape: f32[2,1,128], index: 4, kind: output, shape index: {0}]   ;;  %s1349_s5 = inlined_call_operand.hbm [shape: f32[2,1,128], index: 5, kind: output, shape index: {1}]  }
   0x1   :  { %1359 = sst [smem:[#allocation20_spill]] %s1345_s1 }
   0x2   :  { %11 = vsyncpa [#allocation3], 0 }
   0x3   :  { %13 = vsyncpa [#allocation3 + $0x1], 0 }
   0x4   :  { %14 = vsyncpa [#allocation6], 0 }
   0x5   :  { %16 = vsyncpa [#allocation6 + $0x1], 0 }
   0x6   :  { %17 = vsyncpa [#allocation4], 0 }
   0x7   :  { %19 = vsyncpa [#allocation4 + $0x1], 0 }
   0x8   :  { %20 = vsyncpa [#allocation10], 0 }
   0x9   :  { %22 = vsyncpa [#allocation10 + $0x1], 0  ;;  %s1011_s18 = smov 0   ;;  %s1013_s19 = smov 0  }
   0xa   :  { %s1015_s20 = smov 0   ;;  %s1017_s21 = smov 0  }
   0xb   :  { %s1019_s22 = smov 0   ;;  %s1021_s23 = smov 0  }
   0xc LB: > { %1360 = sst [smem:[#allocation15_spill]] %s959_s20  ;;  %s1042_s24 = sadd.s32 4294967295, %s971_s23   ;;  %s971_s23 = sphi %s1021_s23, %s28_s23   ;;  %s967_s22 = sphi %s1019_s22, %s1386_s22   ;;  %s963_s21 = sphi %s1017_s21, %s1385_s21   ;;  %s959_s20 = sphi %s1015_s20, %s1384_s20   ;;  %s955_s19 = sphi %s1013_s19, %s1388_s19   ;;  %s951_s18 = sphi %s1011_s18, %s1387_s18  }
   0xd   : > { %1361 = sst [smem:[#allocation16_spill]] %s967_s22  ;;  %s658_s25 = sadd.s32 4294967294, %s971_s23  }
   0xe   : > { %1362 = sst [smem:[#allocation17_spill]] %s971_s23  ;;  %s40_s26 = sadd.s32 1, %s967_s22 }
   0xf   : > { %s49_s27 = sadd.s32 1, %s959_s20  ;;  %p42_p0 = scmp.ge.s32.totalorder %s40_s26, 2 }
  0x10   : > { %p56_p1 = scmp.ne.s32.totalorder %s959_s20, %s955_s19  ;;  %p57_p2 = scmp.eq.s32.totalorder %s971_s23, 0 }
  0x11   : > { %p62_p3 = scmp.ne.s32.totalorder %s955_s19, %s951_s18  ;;  %s1390_s26 = smov (%p42_p0, %s40_s26), 0 }
  0x12   : > { %1363 = sst [smem:[#allocation18_spill]] %s1390_s26  ;;  %p1054_p4 = por %p57_p2, %p56_p1 }
  0x13   : > { %p63_p5 = scmp.eq.s32.totalorder %s1042_s24, 0  ;;  %s46_s29 = ssub.s32 %s967_s22, %s1390_s26 }
  0x14   : > { %p170_p6 = scmp.eq.s32.totalorder %s1042_s24, 1  ;;  %p47_p7 = scmp.eq.s32.totalorder %s46_s29, 0 }
  0x15   : > { %p1062_p8 = por %p63_p5, %p62_p3  ;;  %p176_p10 = scmp.eq.s32.totalorder %s658_s25, 1 }
  0x16   : > { %p1066_p9 = por %p170_p6, %p56_p1  ;;  %p706_p13 = scmp.lt.s32.totalorder %s971_s23, 2 }
  0x17   : > { %s1365_s30 = scalar_select %p1062_p8, 1, 0 }
  0x18   : > { %s1366_s6 = scalar_select %p1066_p9, 1, 0 }
  0x19   : > { %s1071_s7 = scalar_select %p47_p7, %s959_s20, %s49_s27  }
  0x1a   : > { %p1073_p11 = por %p176_p10, %p62_p3  ;;  %s1080_s9 = sand.u32 1, %s959_s20  }
  0x1b   : > { %1367 = sst [smem:[#allocation19_spill]] %s1071_s7  ;;  %s241_s10 = sand.u32 1, %s971_s23  }
  0x1c   : > { %s1368_s8 = scalar_select %p1073_p11, 1, 0 }
  0x1d   : > { %s663_s11 = sshll.u32 %s1080_s9, 2  ;;  %p1086_p0 = pnand %p706_p13, %p1054_p4 }
  0x1e   : > { %s664_s13 = sshll.u32 %s967_s22, 6  ;;  %s1370_s1 = sld [smem:[#allocation20_spill]] }
  0x1f   : > { %s1369_s12 = scalar_select %p1086_p0, 1, 0 }
  0x20   : > { %s245_s17 = scalar_lea.vmem [#allocation5], %s663_s11  ;;  %s1100_s27 = scalar_lea.sflag [#allocation6], %s241_s10 }
  0x21   : > { %s253_s25 = sshll.u32 %s245_s17, 4  ;;  %p1106_p4 = pneg %p1086_p0  ;;  %s1097_s25 = int_to_ptr.vmem [resolvable:$true] %s253_s25 }
  0x24   : > { %s1094_s16 = scalar_lea.hbm %s1370_s1, %s664_s13  ;;  %s768_s14 = scalar_lea.hbm %s1370_s1, 128 }
  0x25   : > { %s763_s28 = scalar_lea.hbm %s1094_s16, 64  ;;  %p769_p7 = scmp.lt.u32.totalorder %s1094_s16, %s1370_s1 }
  0x26   : > { %p764_p3 = scmp.ne.s32.totalorder %s1094_s16, %s763_s28  ;;  %p770_p10 = scmp.lt.u32.totalorder %s768_s14, %s763_s28 }
  0x27   : > { %p772_p12 = scmp.lt.u32.totalorder %s763_s28, %s1094_s16 }
  0x28   : > { %p766_p5 = pnand %p1106_p4, %p764_p3  ;;  %p771_p13 = por %p770_p10, %p769_p7 }
  0x2a   : > { %p767_p6 = pneg %p766_p5  ;;  %p773_p1 = por %p772_p12, %p771_p13 }
  0x2c   : > { %p774_p2 = pnand %p773_p1, %p767_p6 }
  0x2e   : > { %777 = shalt.err (!%p774_p2)
}
  0x2f   : > { %s778_s10 = scalar_lea.vmem %s1097_s25, 64  ;;  %s973_s13 = smov [#allocation5]  }
  0x30   : > { %p779_p3 = scmp.ne.s32.totalorder %s1097_s25, %s778_s10  ;;  %s783_s11 = sshll.u32 %s973_s13, 4  ;;  %s784_s11 = int_to_ptr.vmem [resolvable:$false] %s783_s11 }
  0x31   : > { %s785_s15 = scalar_lea.vmem %s784_s11, 128  ;;  %p786_p9 = scmp.lt.s32.totalorder %s1097_s25, %s784_s11 }
  0x32   : > { %p781_p5 = pnand %p779_p3, %p1106_p4  ;;  %p787_p8 = scmp.lt.s32.totalorder %s785_s15, %s778_s10 }
  0x34   : > { %p782_p11 = pneg %p781_p5  ;;  %p788_p7 = por %p787_p8, %p786_p9 }
  0x36   : > { %p789_p10 = pnand %p788_p7, %p782_p11 }
  0x38   : > { %792 = shalt.err (!%p789_p10)
}
  0x39   : > { %695 = dma.hbm_to_vmem [thread:$0]  (!%p1086_p0), %s1094_s16, 64, %s1097_s25, %s1100_s27  }
  0x3a   : > { %p1372_p12 = scmp.lt.s32.totalorder %s971_s23, 3  ;;  %p1373_p1 = scmp.ge.s32.totalorder %s971_s23, 1 }
  0x3b   : > { %s1357_s14 = sshll.u32 %s1080_s9, 3  ;;  %s662_s17 = sshll.u32 %s967_s22, 7 }
  0x3c   : > { %p1134_p2 = pnand %p1373_p1, %p1372_p12  ;;  %s1143_s11 = scalar_lea.hbm %s1344_s0, %s662_s17 }
  0x3d   : > { %s226_s15 = scalar_lea.vmem [#allocation2], %s1357_s14  ;;  %s1152_s26 = scalar_lea.hbm %s1346_s2, %s662_s17 }
  0x3e   : > { %s1374_s28 = scalar_select %p1134_p2, 1, 0 }
  0x3f   : > { %s234_s16 = sshll.u32 %s226_s15, 4  ;;  %s223_s22 = scalar_lea.sflag [#allocation3], %s1080_s9  ;;  %s1147_s16 = int_to_ptr.vmem [resolvable:$true] %s234_s16 }
  0x40   : > { %s793_s7 = scalar_lea.hbm %s1143_s11, 128  ;;  %s798_s20 = scalar_lea.hbm %s1344_s0, 256 }
  0x41   : > { %p794_p8 = scmp.ne.s32.totalorder %s1143_s11, %s793_s7  ;;  %p799_p6 = scmp.lt.u32.totalorder %s1143_s11, %s1344_s0 }
  0x42   : > { %p800_p13 = scmp.lt.u32.totalorder %s798_s20, %s793_s7  ;;  %p802_p5 = scmp.lt.u32.totalorder %s793_s7, %s1143_s11 }
  0x43   : > { %p796_p9 = pnand %p794_p8, %p1106_p4 }
  0x44   : > { %p801_p3 = por %p800_p13, %p799_p6 }
  0x45   : > { %p797_p11 = pneg %p796_p9 }
  0x46   : > { %p803_p7 = por %p802_p5, %p801_p3 }
  0x48   : > { %p804_p10 = pnand %p803_p7, %p797_p11 }
  0x4a   : > { %807 = shalt.err (!%p804_p10)
}
  0x4b   : > { %s808_s1 = scalar_lea.vmem %s1147_s16, 128  ;;  %s974_s17 = smov [#allocation2]  }
  0x4c   : > { %p809_p12 = scmp.ne.s32.totalorder %s1147_s16, %s808_s1  ;;  %s813_s15 = sshll.u32 %s974_s17, 4  ;;  %s814_s15 = int_to_ptr.vmem [resolvable:$false] %s813_s15 }
  0x4d   : > { %s815_s23 = scalar_lea.vmem %s814_s15, 256  ;;  %p816_p9 = scmp.lt.s32.totalorder %s1147_s16, %s814_s15 }
  0x4e   : > { %p811_p1 = pnand %p809_p12, %p1106_p4  ;;  %p817_p2 = scmp.lt.s32.totalorder %s815_s23, %s808_s1 }
  0x50   : > { %p812_p8 = pneg %p811_p1  ;;  %p818_p6 = por %p817_p2, %p816_p9 }
  0x52   : > { %p819_p13 = pnand %p818_p6, %p812_p8 }
  0x54   : > { %822 = shalt.err (!%p819_p13)
}
  0x55   : > { %692 = dma.hbm_to_vmem [thread:$0]  (!%p1086_p0), %s1143_s11, 128, %s1147_s16, %s223_s22  }
  0x56   : > { %s1375_s20 = sshll.u32 %s1080_s9, 3  ;;  %s823_s25 = scalar_lea.hbm %s1152_s26, 128 }
  0x57   : > { %s264_s7 = scalar_lea.vmem [#allocation7], %s1375_s20  ;;  %p824_p11 = scmp.ne.s32.totalorder %s1152_s26, %s823_s25 }
  0x58   : > { %s272_s14 = sshll.u32 %s264_s7, 4  ;;  %s828_s1 = scalar_lea.hbm %s1346_s2, 256  ;;  %s273_s14 = int_to_ptr.vmem [resolvable:$true] %s272_s14 }
  0x59   : > { %p826_p2 = pnand %p824_p11, %p1106_p4  ;;  %p829_p5 = scmp.lt.u32.totalorder %s1152_s26, %s1346_s2 }
  0x5a   : > { %p830_p7 = scmp.lt.u32.totalorder %s828_s1, %s823_s25  ;;  %p832_p12 = scmp.lt.u32.totalorder %s823_s25, %s1152_s26 }
  0x5b   : > { %p827_p3 = pneg %p826_p2 }
  0x5c   : > { %p831_p10 = por %p830_p7, %p829_p5 }
  0x5e   : > { %p833_p1 = por %p832_p12, %p831_p10 }
  0x60   : > { %p834_p8 = pnand %p833_p1, %p827_p3 }
  0x62   : > { %837 = shalt.err (!%p834_p8)
}
  0x63   : > { %s838_s22 = scalar_lea.vmem %s273_s14, 128  ;;  %s975_s9 = smov [#allocation7]  }
  0x64   : > { %p839_p9 = scmp.ne.s32.totalorder %s273_s14, %s838_s22  ;;  %s843_s11 = sshll.u32 %s975_s9, 4  ;;  %s844_s11 = int_to_ptr.vmem [resolvable:$false] %s843_s11 }
  0x65   : > { %s845_s16 = scalar_lea.vmem %s844_s11, 256  ;;  %p846_p11 = scmp.lt.s32.totalorder %s273_s14, %s844_s11 }
  0x66   : > { %p841_p6 = pnand %p839_p9, %p1106_p4  ;;  %p847_p2 = scmp.lt.s32.totalorder %s845_s16, %s838_s22 }
  0x68   : > { %p842_p13 = pneg %p841_p6  ;;  %p848_p0 = por %p847_p2, %p846_p11 }
  0x6a   : > { %p849_p5 = pnand %p848_p0, %p842_p13 }
  0x6c   : > { %852 = shalt.err (!%p849_p5)
}
  0x6d   : > { %p1376_p7 = scmp.ne.s32.totalorder %s1369_s12, 0  ;;  %p1377_p3 = scmp.ne.s32.totalorder %s1374_s28, 0 }
  0x6e   : > { %s1199_s29 = sand.u32 (!%p1377_p3), 1, %s955_s19   ;;  %p1378_p0 = scmp.ne.s32.totalorder (!%p1377_p3), %s1365_s30, 0 }
  0x6f   : > { %698 = dma.hbm_to_vmem [thread:$0]  (!%p1376_p7), %s1152_s26, 128, %s273_s14, %s1100_s27  }
  0x70   : > { %290 = sbr.rel (%p1377_p3) target bundleno = 204 (0xcc), region = 36  ;;  %s668_s23 = sshll.u32 (!%p1377_p3), %s1199_s29, 3 }
  0x71   : > { %s293_s20 = scalar_lea.sflag (!%p1377_p3), [#allocation3], %s1199_s29  ;;  %s1203_s7 = scalar_lea.vmem (!%p1377_p3), [#allocation2], %s668_s23 }
  0x77   : > { %934 = dma.done.wait (%p1378_p0), %s293_s20, 128  }
  0x78   : > { %936 = vsyncadd (%p1378_p0), %s293_s20, 4294967168  ;;  %s301_s26 = sand.u32 1, %s1042_s24   ;;  %s669_s12 = sshll.u32 %s1199_s29, 2 }
  0x79   : > { %s302_s27 = scalar_lea.sflag [#allocation6], %s301_s26  ;;  %s305_s28 = scalar_lea.vmem [#allocation5], %s669_s12 }
  0x7a   : > { %938 = dma.done.wait (%p1378_p0), %s302_s27, 192  }
  0x7b   : > { %940 = vsyncadd (%p1378_p0), %s302_s27, 4294967104  ;;  %p363_p4 = scmp.lt.s32.totalorder %s963_s21, 1  ;;  %s1217_s14 = scalar_lea.vmem [#allocation8], %s1199_s29  ;;  %v976_v0 = vmov 0.0   ;;  %v433_v1 = vlaneseq  ;;  %v977_v2 = vmov 1966171168  }
  0x7c   : > { %372 = vst [vmem:[%s1217_s14] sm:$0x1] %v976_v0  ;;  %v431_v3 = vunpack.c.l.s4 %v977_v2  ;;  %s1222_s24 = scalar_lea.vmem [#allocation9], %s1199_s29  ;;  %v375_v6 = vld [vmem:[%s305_s28] sm:$0xf]  ;;  %s314_s17 = scalar_lea.vmem [#allocation7], %s668_s23  ;;  %vm399_vm2 = vcmask 1043456  }
  0x7d   : > { %373 = vst [vmem:[%s1222_s24] sm:$0x1] %v976_v0  ;;  %s364_s30 = scalar_select %p363_p4, %s963_s21, 1  ;;  %v434_v5 = vshrl.u32 %v433_v1, 7  ;;  %v376_v7 = vld [vmem:[%s314_s17] sm:$0x1f]  ;;  %v383_v9 = vsub.f32 1.0, %v375_v6  ;;  %759 = vlog2.f32 %v375_v6 }
  0x7e   : > { %v432_v4 = vunpack.c.0.s8 %v431_v3  ;;  %vm408_vm0 = vcmp.eq.f32.partialorder %v376_v7, 1.0  ;;  %s675_s15 = sshll.u32 %s963_s21, 4  ;;  %s497_s22 = sshll.u32 %s1222_s24, 4  ;;  %v1243_v20 = vld [vmem:[%s1203_s7] sm:$0x1f]  ;;  %v978_v28 = vmov 0.75   ;;  %s1253_s22 = int_to_ptr.vmem [resolvable:$true] %s497_s22 }
  0x7f   : > { %s671_s25 = sshll.u32 %s364_s30, 2  ;;  %761 = vlog2.f32 %v383_v9  ;;  %v1233_v11 = vsel %vm408_vm0, 1.0, %v976_v0  ;;  %vm381_vm3 = vcmp.eq.f32.partialorder %v1243_v20, 1.0  ;;  %s1251_s16 = scalar_lea.hbm %s1349_s5, %s675_s15 }
  0x80   : > { %s366_s1 = scalar_lea.vmem %s1347_s3, %s671_s25  ;;  %v1230_v10 = vsub.s32 %v432_v4, %v434_v5  ;;  %v449_v13 = vcombine.high %v1233_v11, %v1233_v11  ;;  %v382_v29 = vsel %vm381_vm3, 0.25, %v978_v28  ;;  %v384_v30 = vsel %vm381_vm3, %v383_v9, %v375_v6  ;;  %s472_s23 = scalar_lea.sflag [#allocation10], %s1199_s29 }
  0x81   : > { %v377_v8 = vld [vmem:[%s366_s1] sm:$0xf]  ;;  %s853_s20 = scalar_lea.vmem %s1253_s22, 16  ;;  %p1379_p12 = scmp.ne.s32.totalorder %s1366_s6, 0 }
  0x82   : > { %v411_v12 = vsub.f32 %v377_v8, %v376_v7  ;;  %v456_v15 = vrot.slane %v449_v13, %v1230_v10  ;;  %p854_p10 = scmp.ne.s32.totalorder %s1253_s22, %s853_s20  ;;  %s979_s7 = smov [#allocation9]  }
  0x83   : > { %s857_s26 = sshll.u32 %s979_s7, 4  ;;  %s858_s26 = int_to_ptr.vmem [resolvable:$false] %s857_s26 }
  0x84   : > { %v412_v14 = vand.u32 2147483647, %v411_v12  ;;  %v447_v18 = vld [vmem:[%s1222_s24] sm:$0x1]  ;;  %v463_v19 = vrot.slane %v456_v15, %v1230_v10  ;;  %p855_p1 = pnand %p854_p10, %p1379_p12  ;;  %s859_s12 = scalar_lea.vmem %s858_s26, 32 }
  0x85   : > { %p860_p9 = scmp.lt.s32.totalorder %s1253_s22, %s858_s26  ;;  %p861_p6 = scmp.lt.s32.totalorder %s859_s12, %s853_s20 }
  0x86   : > { %v414_v16 = vmul.f32 4.5, %v412_v14  ;;  %v674_v17 = vadd.f32 -0.055555556, %v412_v14  ;;  %vm413_vm1 = vcmp.lt.f32.partialorder %v412_v14, 0.11111111  ;;  %v465_v22 = vadd.f32 %v463_v19, %v447_v18  ;;  %p856_p8 = pneg %p855_p1 }
  0x87   : > { %v760_v23 = vpop.eup %759  ;;  %p862_p13 = por %p861_p6, %p860_p9 }
  0x88   : > { %v415_v21 = vmul.f32 %v414_v16, %v412_v14  ;;  %v388_v25 = vmul.f32 0.6931472, %v760_v23  ;;  %466 = vst [vmem:[%s1222_s24] sm:$0x1] %v465_v22 }
  0x89   : > { %v762_v27 = vpop.eup %761  ;;  %p863_p11 = pnand %p862_p13, %p856_p8 }
  0x8a   : > { %v417_v24 = vsel %vm413_vm1, %v415_v21, %v674_v17 }
  0x8b   : > { %v418_v26 = vsel %vm399_vm2, %v417_v24, 0.0 }
  0x8c   : > { %v419_v31 = vrot.slane %v418_v26, 4 }
  0x8d   : > { %866 = shalt.err (!%p863_p11)
}
  0x8e   : > { %s867_s27 = scalar_lea.hbm %s1251_s16, 16  ;;  %s871_s30 = scalar_lea.hbm %s1349_s5, 32 }
  0x8f   : > { %p868_p2 = scmp.ne.s32.totalorder %s1251_s16, %s867_s27  ;;  %p872_p3 = scmp.lt.u32.totalorder %s1251_s16, %s1349_s5 }
  0x90   : > { %p873_p0 = scmp.lt.u32.totalorder %s871_s30, %s867_s27  ;;  %p875_p10 = scmp.lt.u32.totalorder %s867_s27, %s1251_s16 }
  0x91   : > { %p869_p5 = pnand %p868_p2, %p1379_p12 }
  0x92   : > { %p874_p4 = por %p873_p0, %p872_p3 }
  0x93   : > { %p870_p7 = pneg %p869_p5 }
  0x94   : > { %p876_p1 = por %p875_p10, %p874_p4 }
  0x96   : > { %p877_p8 = pnand %p876_p1, %p870_p7 }
  0x98   : > { %880 = shalt.err (!%p877_p8)
}
  0x99   : > { %686 = dma.vmem_to_hbm [thread:$0]  (%p1379_p12), %s1253_s22, 16, %s1251_s16, %s472_s23   ;;  %v389_v32 = vmax.f32 %v388_v25, -100.0  ;;  %v391_v33 = vmul.f32 0.6931472, %v762_v27  ;;  %v394_v34 = vsub.f32 1.0, %v1243_v20  ;;  %v385_v35 = vmul.f32 %v384_v30, %v382_v29 }
  0x9a   : > { %v420_v38 = vadd.f32 %v419_v31, %v418_v26  ;;  %vm378_vm4 = vcmp.ne.f32.partialorder %v1243_v20, -1.0  ;;  %v426_v61 = vld [vmem:[%s1217_s14] sm:$0x1]  ;;  %s484_s13 = sshll.u32 %s1217_s14, 4  ;;  %s1294_s22 = scalar_lea.hbm %s1348_s4, %s675_s15  ;;  %s1296_s13 = int_to_ptr.vmem [resolvable:$true] %s484_s13 }
  0x9b   : > { %v392_v36 = vmax.f32 %v391_v33, -100.0  ;;  %v393_v37 = vmul.f32 %v389_v32, %v1243_v20  ;;  %v386_v40 = vmul.f32 %v385_v35, %v384_v30  ;;  %v672_v54 = vsel %vm378_vm4, 1.0, %v976_v0  ;;  %s468_s9 = scalar_lea.sflag [#allocation4], %s1199_s29  ;;  %s881_s11 = scalar_lea.vmem %s1296_s13, 16 }
  0x9c   : > { %v421_v42 = vrot.slane %v420_v38, 2  ;;  %p882_p9 = scmp.ne.s32.totalorder %s1296_s13, %s881_s11  ;;  %s980_s16 = smov [#allocation8]  }
  0x9d   : > { %v395_v39 = vmul.f32 %v394_v34, %v392_v36  ;;  %s885_s23 = sshll.u32 %s980_s16, 4  ;;  %s886_s23 = int_to_ptr.vmem [resolvable:$false] %s885_s23 }
  0x9e   : > { %v422_v45 = vadd.f32 %v421_v42, %v420_v38  ;;  %p883_p6 = pnand %p882_p9, %p1379_p12  ;;  %s887_s21 = scalar_lea.vmem %s886_s23, 32 }
  0x9f   : > { %v396_v41 = vadd.f32 %v395_v39, %v393_v37  ;;  %p888_p11 = scmp.lt.s32.totalorder %s1296_s13, %s886_s23  ;;  %p889_p2 = scmp.lt.s32.totalorder %s887_s21, %s881_s11 }
  0xa0   : > { %v423_v49 = vrot.slane %v422_v45, 1  ;;  %p884_p13 = pneg %p883_p6 }
  0xa1   : > { %v397_v43 = vsub.f32 0.0, %v396_v41  ;;  %p890_p5 = por %p889_p2, %p888_p11 }
  0xa2   : > { %v424_v52 = vadd.f32 %v423_v49, %v422_v45 }
  0xa3   : > { %v398_v44 = vmul.f32 %v397_v43, %v386_v40  ;;  %p891_p7 = pnand %p890_p5, %p884_p13 }
  0xa4   : > { %v425_v56 = vmul.f32 %v1233_v11, %v424_v52 }
  0xa5   : > { %v400_v46 = vsel %vm399_vm2, %v398_v44, 0.0 }
  0xa6   : > { %v401_v47 = vrot.slane %v400_v46, 4 }
  0xa8   : > { %v402_v48 = vadd.f32 %v401_v47, %v400_v46 }
  0xaa   : > { %v403_v50 = vrot.slane %v402_v48, 2 }
  0xac   : > { %v404_v51 = vadd.f32 %v403_v50, %v402_v48 }
  0xae   : > { %v405_v53 = vrot.slane %v404_v51, 1 }
  0xb0   : > { %v406_v55 = vadd.f32 %v405_v53, %v404_v51 }
  0xb2   : > { %v407_v57 = vmul.f32 %v672_v54, %v406_v55 }
  0xb4   : > { %v427_v58 = vadd.f32 %v425_v56, %v407_v57 }
  0xb6   : > { %v429_v59 = vcombine.high %v427_v58, %v427_v58 }
  0xb8   : > { %v436_v60 = vrot.slane %v429_v59, %v1230_v10 }
  0xba   : > { %v443_v62 = vrot.slane %v436_v60, %v1230_v10 }
  0xbc   : > { %v445_v63 = vadd.f32 %v443_v62, %v426_v61 }
  0xbe   : > { %446 = vst [vmem:[%s1217_s14] sm:$0x1] %v445_v63 }
  0xbf   : > { %894 = shalt.err (!%p891_p7)
}
  0xc0   : > { %s895_s29 = scalar_lea.hbm %s1294_s22, 16  ;;  %s899_s20 = scalar_lea.hbm %s1348_s4, 32 }
  0xc1   : > { %p896_p3 = scmp.ne.s32.totalorder %s1294_s22, %s895_s29  ;;  %p900_p10 = scmp.lt.u32.totalorder %s1294_s22, %s1348_s4 }
  0xc2   : > { %p901_p1 = scmp.lt.u32.totalorder %s899_s20, %s895_s29  ;;  %p903_p9 = scmp.lt.u32.totalorder %s895_s29, %s1294_s22 }
  0xc3   : > { %p897_p0 = pnand %p896_p3, %p1379_p12 }
  0xc4   : > { %p902_p8 = por %p901_p1, %p900_p10 }
  0xc5   : > { %p898_p4 = pneg %p897_p0 }
  0xc6   : > { %p904_p6 = por %p903_p9, %p902_p8 }
  0xc8   : > { %p905_p13 = pnand %p904_p6, %p898_p4 }
  0xca   : > { %908 = shalt.err (!%p905_p13)
}
  0xcb   : > { %685 = dma.vmem_to_hbm [thread:$0]  (%p1379_p12), %s1296_s13, 16, %s1294_s22, %s468_s9  }
  0xcc PF: > { %s1380_s12 = sld [smem:[#allocation17_spill]]  ;;  %s509_s27 = sand.u32 1, %s951_s18  }
  0xcd   : > { %p1381_p11 = scmp.ne.s32.totalorder %s1368_s8, 0  ;;  %s510_s28 = scalar_lea.sflag [#allocation4], %s509_s27 }
  0xd2   : > { %p1382_p2 = scmp.ge.s32.totalorder %s1380_s12, 2 }
  0xd4   : > { %p700_p5 = pnand %p1382_p2, %p1381_p11 }
  0xd6   : > { %942 = dma.done.wait (!%p700_p5), %s510_s28, 16  }
  0xd7   : > { %944 = vsyncadd (!%p700_p5), %s510_s28, 4294967280  ;;  %s518_s24 = scalar_lea.sflag [#allocation10], %s509_s27 }
  0xd8   : > { %946 = dma.done.wait (!%p700_p5), %s518_s24, 16  }
  0xd9   : > { %948 = vsyncadd (!%p700_p5), %s518_s24, 4294967280  ;;  %s28_s23 = sadd.s32 1, %s1380_s12   ;;  %s1383_s6 = sld [smem:[#allocation15_spill]] }
  0xda   : > { %p25_p7 = scmp.ge.s32.totalorder %s28_s23, 4   ;;  %s1384_s20 = sld [smem:[#allocation19_spill]] }
  0xdb   : > { %s1385_s21 = sld [smem:[#allocation16_spill]]  ;;  %s1386_s22 = sld [smem:[#allocation18_spill]] }
  0xdc   : > { %s1387_s18 = smov %s955_s19  ;;  %27 = sbr.rel (!%p25_p7) target bundleno = 12 (0xc), region = 129 }
  0xdf   : > { %s1388_s19 = smov %s1383_s6 }
  0xe3   :  { %522 = vsyncpa [#allocation3], 1 }
  0xe4   :  { %524 = vsyncpa [#allocation3 + $0x1], 1 }
  0xe5   :  { %525 = vsyncpa [#allocation6], 1 }
  0xe6   :  { %527 = vsyncpa [#allocation6 + $0x1], 1 }
  0xe7   :  { %528 = vsyncpa [#allocation4], 1 }
  0xe8   :  { %530 = vsyncpa [#allocation4 + $0x1], 1 }
  0xe9   :  { %531 = vsyncpa [#allocation10], 1 }
  0xea   :  { %533 = vsyncpa [#allocation10 + $0x1], 1 }

</bundles_post_ra>
